<compile_context>
chip_gen: v5e
topology: v5e:2x2
jax: 0.10.0
libtpu: 0.0.40
codegen_flags: <defaults>
</compile_context>

<pallas_src>
import functools
import math

import jax
import jax.numpy as jnp
from jax.experimental import pallas as pl
from jax.experimental.pallas import tpu as pltpu

D_MODEL = 128          # demo-sized d_model (module default is 2048; same code path)
NUM_HEADS = 8
HEAD_DIM = D_MODEL // NUM_HEADS


# --------------------------------------------------------------------------- #
# Kernel
# --------------------------------------------------------------------------- #
def mha_cls_kernel(x_ref, wsv_ref, bsv_ref, scls_ref, vcls_ref, wo_ref, bo_ref,
                   out_ref, *, n_valid):
    xb = x_ref[...]                                      # (Bt, Np, D)
    Bt, Np, D = xb.shape

    # One fused (Bt*Np, D) @ (D, 2D) matmul: left half = lane-replicated
    # per-head class-token scores, right half = V projection.
    kv = jnp.dot(xb.reshape(Bt * Np, D), wsv_ref[...],
                 preferred_element_type=jnp.float32) + bsv_ref[...]
    scores = kv[:, :D].reshape(Bt, Np, D)                # (Bt, Np, D)
    v = kv[:, D:].reshape(Bt, Np, D)                     # (Bt, Np, D)

    if n_valid < Np:
        # Padded key positions must not participate in the softmax.
        t_idx = jax.lax.broadcasted_iota(jnp.int32, (Bt, Np, D), 1)
        scores = jnp.where(t_idx < n_valid, scores, jnp.float32(-1e30))

    # Softmax over keys (sequence axis) with the class-token key folded in.
    # Scores are replicated across each head's 16 lanes, so per-lane reductions
    # are per-head reductions.
    s_cls = scls_ref[...]                                # (1, D) per-head const
    m = jnp.maximum(jnp.max(scores, axis=1), s_cls)      # (Bt, D)
    p = jnp.exp(scores - m[:, None, :])                  # (Bt, Np, D)
    p_cls = jnp.exp(s_cls - m)                           # (Bt, D)
    denom = jnp.sum(p, axis=1) + p_cls                   # (Bt, D)
    num = jnp.sum(p * v, axis=1) + p_cls * vcls_ref[...] # (Bt, D)

    r = pl.reciprocal(denom, approx=True)                # EUP slot
    r = r * (2.0 - denom * r)                            # one Newton step
    attn = num * r                                       # (Bt, D)

    # Output projection of the class-token row only.
    out_ref[...] = (jnp.dot(attn, wo_ref[...],
                            preferred_element_type=jnp.float32) + bo_ref[...])


# --------------------------------------------------------------------------- #
# Parameter prep (run ONCE per weight load, not per request)
# --------------------------------------------------------------------------- #
def prepare_params(params):
    D = params["wq"].shape[0]
    scale = 1.0 / math.sqrt(HEAD_DIM)

    cls = params["class_token"][0]                               # (1, D)
    # Class-token query (parameter-only), pre-scaled by 1/sqrt(head_dim).
    q0s = (cls @ params["wq"] + params["bq"]) * scale            # (1, D)

    # Block-diagonal per-head group-sum matrix.
    head_id = jnp.arange(D, dtype=jnp.int32) // HEAD_DIM
    gg = (head_id[:, None] == head_id[None, :]).astype(jnp.float32)

    # Fold query + group-sum into the K weights: x @ ws == lane-replicated
    # per-head scores.  bk is dropped: its contribution is a per-head constant
    # that cancels after the softmax max-subtraction (also dropped from s_cls
    # below, so the shift is uniform across all key positions).
    ws = (params["wk"] * q0s) @ gg                               # (D, D)
    wsv = jnp.concatenate([ws, params["wv"]], axis=1)            # (D, 2D)
    bsv = jnp.concatenate([jnp.zeros_like(params["bv"]), params["bv"]], axis=1)

    s_cls = cls @ ws                                             # (1, D)
    v_cls = cls @ params["wv"] + params["bv"]                    # (1, D)

    return {"wsv": wsv, "bsv": bsv, "s_cls": s_cls, "v_cls": v_cls,
            "wo": params["wo"], "bo": params["bo"]}


# --------------------------------------------------------------------------- #
# Wrapper
# --------------------------------------------------------------------------- #
def _pick_bt(B, Np, target_rows=2048, max_rows=4096):
    """Batch tile: ~target_rows projection rows/step, capped for v7x VMEM."""
    cap = max(8, ((max_rows // max(Np, 1)) // 8) * 8)
    tgt = max(8, ((target_rows // max(Np, 1)) // 8) * 8)
    tgt = min(tgt, cap)
    if B < 16:
        return B, B                      # one full-extent block, no padding
    # At least 2 grid steps so both v7x TensorCores get blocks.
    tgt = min(tgt, max(8, ((B // 2) // 8) * 8))
    for bt in range(tgt, 7, -8):         # prefer a divisor of B -> no batch pad
        if B % bt == 0:
            return bt, B
    b_pad = -(-B // tgt) * tgt
    return tgt, b_pad


def mha_classifier(x, prep):
    """x: (B, N, D) float32.  Returns (B, D) class-token output."""
    B, N, D = x.shape
    assert D == D_MODEL

    # Keep the sequence dim a multiple of 8 so in-kernel reshapes stay free
    # reinterpretations of the (8,128) tiling; padded keys are masked in-kernel.
    Np = -(-N // 8) * 8
    if Np != N:
        x = jnp.pad(x, ((0, 0), (0, Np - N), (0, 0)))

    bt, b_pad = _pick_bt(B, Np)
    if b_pad != B:
        x = jnp.pad(x, ((0, b_pad - B), (0, 0), (0, 0)))

    def wspec(shape):
        return pl.BlockSpec(shape, lambda b: (0,) * len(shape))

    kernel = functools.partial(mha_cls_kernel, n_valid=N)

    out = pl.pallas_call(
        kernel,
        out_shape=jax.ShapeDtypeStruct((b_pad, D), jnp.float32),
        grid_spec=pltpu.PrefetchScalarGridSpec(
            num_scalar_prefetch=0,
            grid=(b_pad // bt,),
            in_specs=[
                pl.BlockSpec((bt, Np, D), lambda b: (b, 0, 0)),   # x
                wspec((D, 2 * D)),                                # [Ws | Wv]
                wspec((1, 2 * D)),                                # [0  | bv]
                wspec((1, D)),                                    # s_cls
                wspec((1, D)),                                    # v_cls
                wspec((D, D)),                                    # wo
                wspec((1, D)),                                    # bo
            ],
            out_specs=pl.BlockSpec((bt, D), lambda b: (b, 0)),
        ),
        compiler_params=pltpu.CompilerParams(
            dimension_semantics=("parallel",),
            vmem_limit_bytes=48 * 1024 * 1024,   # > default scoped limit, < v7x 64 MiB
        ),
    )(x, prep["wsv"], prep["bsv"], prep["s_cls"], prep["v_cls"],
      prep["wo"], prep["bo"])
    return out[:B]


# --------------------------------------------------------------------------- #
# Reference + demo
# --------------------------------------------------------------------------- #
def init_params(key, d_model=D_MODEL):
    ks = jax.random.split(key, 9)

    def lin(kw):
        # (in, out) layout == torch weight.T ; deterministic synthetic init.
        return 0.02 * jax.random.normal(kw, (d_model, d_model), jnp.float32)

    return {
        "wq": lin(ks[0]), "bq": 0.01 * jax.random.normal(ks[1], (1, d_model), jnp.float32),
        "wk": lin(ks[2]), "bk": 0.01 * jax.random.normal(ks[3], (1, d_model), jnp.float32),
        "wv": lin(ks[4]), "bv": 0.01 * jax.random.normal(ks[5], (1, d_model), jnp.float32),
        "wo": lin(ks[6]), "bo": 0.01 * jax.random.normal(ks[7], (1, d_model), jnp.float32),
        "class_token": jax.random.normal(ks[8], (1, 1, d_model), jnp.float32),
    }


def reference(x, p):
    """Plain-JAX reference matching the PyTorch forward exactly."""
    B, N, D = x.shape
    cls = jnp.broadcast_to(p["class_token"], (B, 1, D))
    xc = jnp.concatenate([cls, x], axis=1)

    def proj(w, b):
        return xc @ w + b[0]

    q = proj(p["wq"], p["bq"]).reshape(B, N + 1, NUM_HEADS, HEAD_DIM).transpose(0, 2, 1, 3)
    k = proj(p["wk"], p["bk"]).reshape(B, N + 1, NUM_HEADS, HEAD_DIM).transpose(0, 2, 1, 3)
    v = proj(p["wv"], p["bv"]).reshape(B, N + 1, NUM_HEADS, HEAD_DIM).transpose(0, 2, 1, 3)
    s = jnp.einsum("bhqd,bhkd->bhqk", q, k) / math.sqrt(HEAD_DIM)
    pr = jax.nn.softmax(s, axis=-1)
    o = jnp.einsum("bhqk,bhkd->bhqd", pr, v).transpose(0, 2, 1, 3).reshape(B, N + 1, D)
    y = o @ p["wo"] + p["bo"][0]
    return y[:, 0, :]


if __name__ == "__main__":
    key = jax.random.PRNGKey(0)
    kx, kp = jax.random.split(key)
    B, N = 16, 8                                  # N multiple of 8; grid = 2 blocks
    x = jax.random.normal(kx, (B, N, D_MODEL), jnp.float32)
    params = init_params(kp)

    prep = prepare_params(params)                 # one-time parameter prep
    out = mha_classifier(x, prep)
    out = jax.block_until_ready(out)

    ref = reference(x, params)
    assert out.shape == (B, D_MODEL)
    assert jnp.allclose(out, ref, atol=1e-4, rtol=1e-4)
    print("KERNEL_OK")
</pallas_src>

<mosaic_0001>
module attributes {stable_mosaic.version = 11 : i64} {
  func.func @mha_cls_kernel(%arg0: i32, %arg1: memref<8x8x128xf32, #tpu.memory_space<vmem>>, %arg2: memref<128x256xf32, #tpu.memory_space<vmem>>, %arg3: memref<1x256xf32, #tpu.memory_space<vmem>>, %arg4: memref<1x128xf32, #tpu.memory_space<vmem>>, %arg5: memref<1x128xf32, #tpu.memory_space<vmem>>, %arg6: memref<128x128xf32, #tpu.memory_space<vmem>>, %arg7: memref<1x128xf32, #tpu.memory_space<vmem>>, %arg8: memref<8x128xf32, #tpu.memory_space<vmem>>) attributes {dimension_semantics = [#tpu.dimension_semantics<parallel>], iteration_bounds = array<i64: 2>, scalar_prefetch = 0 : i64, scratch_operands = 0 : i64, tpu.core_type = #tpu.core_type<tc>, window_params = [{transform_indices = @transform_0, window_bounds = array<i64: 8, 8, 128>}, {pipeline_mode = #tpu.pipeline_mode<synchronous>, transform_indices = @transform_1, window_bounds = array<i64: 128, 256>}, {pipeline_mode = #tpu.pipeline_mode<synchronous>, transform_indices = @transform_2, window_bounds = array<i64: 1, 256>}, {pipeline_mode = #tpu.pipeline_mode<synchronous>, transform_indices = @transform_3, window_bounds = array<i64: 1, 128>}, {pipeline_mode = #tpu.pipeline_mode<synchronous>, transform_indices = @transform_4, window_bounds = array<i64: 1, 128>}, {pipeline_mode = #tpu.pipeline_mode<synchronous>, transform_indices = @transform_5, window_bounds = array<i64: 128, 128>}, {pipeline_mode = #tpu.pipeline_mode<synchronous>, transform_indices = @transform_6, window_bounds = array<i64: 1, 128>}, {transform_indices = @transform_7, window_bounds = array<i64: 8, 128>}]} {
    %c0 = arith.constant 0 : index
    %c0_0 = arith.constant 0 : index
    %c0_1 = arith.constant 0 : index
    %0 = vector.load %arg1[%c0, %c0_0, %c0_1] : memref<8x8x128xf32, #tpu.memory_space<vmem>>, vector<8x8x128xf32>
    %1 = vector.shape_cast %0 : vector<8x8x128xf32> to vector<64x128xf32>
    %c0_2 = arith.constant 0 : index
    %c0_3 = arith.constant 0 : index
    %2 = vector.load %arg2[%c0_2, %c0_3] : memref<128x256xf32, #tpu.memory_space<vmem>>, vector<128x256xf32>
    %cst = arith.constant dense<0.000000e+00> : vector<64x256xf32>
    %3 = tpu.matmul %1, %2, %cst {dimension_numbers = #tpu.dot_dimension_numbers<[1], [0], [0], [1], [0, 0, 1, 1], [], []>} : vector<64x128xf32>, vector<128x256xf32>, vector<64x256xf32> -> vector<64x256xf32>
    %c0_4 = arith.constant 0 : index
    %c0_5 = arith.constant 0 : index
    %4 = vector.load %arg3[%c0_4, %c0_5] : memref<1x256xf32, #tpu.memory_space<vmem>>, vector<1x256xf32>
    %5 = vector.broadcast %4 : vector<1x256xf32> to vector<64x256xf32>
    %6 = arith.addf %3, %5 : vector<64x256xf32>
    %7 = vector.extract_strided_slice %6 {offsets = [0, 0], sizes = [64, 128], strides = [1, 1]} : vector<64x256xf32> to vector<64x128xf32>
    %8 = vector.shape_cast %7 : vector<64x128xf32> to vector<8x8x128xf32>
    %9 = vector.extract_strided_slice %6 {offsets = [0, 128], sizes = [64, 128], strides = [1, 1]} : vector<64x256xf32> to vector<64x128xf32>
    %10 = vector.shape_cast %9 : vector<64x128xf32> to vector<8x8x128xf32>
    %c0_6 = arith.constant 0 : index
    %c0_7 = arith.constant 0 : index
    %11 = vector.load %arg4[%c0_6, %c0_7] : memref<1x128xf32, #tpu.memory_space<vmem>>, vector<1x128xf32>
    %cst_8 = arith.constant dense<0xFF800000> : vector<8x128xf32>
    %12 = vector.multi_reduction <maximumf>, %8, %cst_8 [1] : vector<8x8x128xf32> to vector<8x128xf32>
    %13 = vector.broadcast %11 : vector<1x128xf32> to vector<8x128xf32>
    %14 = arith.maximumf %12, %13 : vector<8x128xf32>
    %15 = vector.shape_cast %14 : vector<8x128xf32> to vector<8x1x128xf32>
    %16 = vector.broadcast %15 : vector<8x1x128xf32> to vector<8x8x128xf32>
    %17 = arith.subf %8, %16 : vector<8x8x128xf32>
    %18 = math.exp %17 : vector<8x8x128xf32>
    %19 = vector.broadcast %11 : vector<1x128xf32> to vector<8x128xf32>
    %20 = arith.subf %19, %14 : vector<8x128xf32>
    %21 = math.exp %20 : vector<8x128xf32>
    %cst_9 = arith.constant dense<0.000000e+00> : vector<8x128xf32>
    %22 = vector.multi_reduction <add>, %18, %cst_9 [1] : vector<8x8x128xf32> to vector<8x128xf32>
    %23 = arith.addf %22, %21 : vector<8x128xf32>
    %24 = arith.mulf %18, %10 : vector<8x8x128xf32>
    %cst_10 = arith.constant dense<0.000000e+00> : vector<8x128xf32>
    %25 = vector.multi_reduction <add>, %24, %cst_10 [1] : vector<8x8x128xf32> to vector<8x128xf32>
    %c0_11 = arith.constant 0 : index
    %c0_12 = arith.constant 0 : index
    %26 = vector.load %arg5[%c0_11, %c0_12] : memref<1x128xf32, #tpu.memory_space<vmem>>, vector<1x128xf32>
    %27 = vector.broadcast %26 : vector<1x128xf32> to vector<8x128xf32>
    %28 = arith.mulf %21, %27 : vector<8x128xf32>
    %29 = arith.addf %25, %28 : vector<8x128xf32>
    %30 = tpu.reciprocal %23 {approx = true} : vector<8x128xf32> -> vector<8x128xf32>
    %31 = arith.mulf %23, %30 : vector<8x128xf32>
    %cst_13 = arith.constant 2.000000e+00 : f32
    %32 = vector.broadcast %cst_13 : f32 to vector<8x128xf32>
    %33 = arith.subf %32, %31 : vector<8x128xf32>
    %34 = arith.mulf %30, %33 : vector<8x128xf32>
    %35 = arith.mulf %29, %34 : vector<8x128xf32>
    %c0_14 = arith.constant 0 : index
    %c0_15 = arith.constant 0 : index
    %36 = vector.load %arg6[%c0_14, %c0_15] : memref<128x128xf32, #tpu.memory_space<vmem>>, vector<128x128xf32>
    %cst_16 = arith.constant dense<0.000000e+00> : vector<8x128xf32>
    %37 = tpu.matmul %35, %36, %cst_16 {dimension_numbers = #tpu.dot_dimension_numbers<[1], [0], [0], [1], [0, 0, 1, 1], [], []>} : vector<8x128xf32>, vector<128x128xf32>, vector<8x128xf32> -> vector<8x128xf32>
    %c0_17 = arith.constant 0 : index
    %c0_18 = arith.constant 0 : index
    %38 = vector.load %arg7[%c0_17, %c0_18] : memref<1x128xf32, #tpu.memory_space<vmem>>, vector<1x128xf32>
    %39 = vector.broadcast %38 : vector<1x128xf32> to vector<8x128xf32>
    %40 = arith.addf %37, %39 : vector<8x128xf32>
    %c0_19 = arith.constant 0 : index
    %c0_20 = arith.constant 0 : index
    %41 = vector.load %arg8[%c0_19, %c0_20] : memref<8x128xf32, #tpu.memory_space<vmem>>, vector<8x128xf32>
    tpu.vector_store %arg8[%c0_19, %c0_20], %40 {strides = array<i32>} : memref<8x128xf32, #tpu.memory_space<vmem>>, vector<8x128xf32>,
    return
  }
  func.func @transform_0(%arg0: i32) -> (i32, i32, i32) {
    %c0_i32 = arith.constant 0 : i32
    %c0_i32_0 = arith.constant 0 : i32
    %c0_i32_1 = arith.constant 0 : i32
    return %arg0, %c0_i32, %c0_i32_0 : i32, i32, i32
  }
  func.func @transform_1(%arg0: i32) -> (i32, i32) {
    %c0_i32 = arith.constant 0 : i32
    %c0_i32_0 = arith.constant 0 : i32
    %c0_i32_1 = arith.constant 0 : i32
    return %c0_i32, %c0_i32_0 : i32, i32
  }
  func.func @transform_2(%arg0: i32) -> (i32, i32) {
    %c0_i32 = arith.constant 0 : i32
    %c0_i32_0 = arith.constant 0 : i32
    %c0_i32_1 = arith.constant 0 : i32
    return %c0_i32, %c0_i32_0 : i32, i32
  }
  func.func @transform_3(%arg0: i32) -> (i32, i32) {
    %c0_i32 = arith.constant 0 : i32
    %c0_i32_0 = arith.constant 0 : i32
    %c0_i32_1 = arith.constant 0 : i32
    return %c0_i32, %c0_i32_0 : i32, i32
  }
  func.func @transform_4(%arg0: i32) -> (i32, i32) {
    %c0_i32 = arith.constant 0 : i32
    %c0_i32_0 = arith.constant 0 : i32
    %c0_i32_1 = arith.constant 0 : i32
    return %c0_i32, %c0_i32_0 : i32, i32
  }
  func.func @transform_5(%arg0: i32) -> (i32, i32) {
    %c0_i32 = arith.constant 0 : i32
    %c0_i32_0 = arith.constant 0 : i32
    %c0_i32_1 = arith.constant 0 : i32
    return %c0_i32, %c0_i32_0 : i32, i32
  }
  func.func @transform_6(%arg0: i32) -> (i32, i32) {
    %c0_i32 = arith.constant 0 : i32
    %c0_i32_0 = arith.constant 0 : i32
    %c0_i32_1 = arith.constant 0 : i32
    return %c0_i32, %c0_i32_0 : i32, i32
  }
  func.func @transform_7(%arg0: i32) -> (i32, i32) {
    %c0_i32 = arith.constant 0 : i32
    %c0_i32_0 = arith.constant 0 : i32
    return %arg0, %c0_i32 : i32, i32
  }
}

</mosaic_0001>

<bundles_post_ra>
// kernel: tpu_custom_call.1
= control target key start
LH: loop header
LB: loop body
LE: loop exit
PB: predicated region body
PF: predicated region fallthrough
CT: control target
= control target key end

     0   :  { %s1701_s0 = inlined_call_operand.hbm [shape: f32[16,8,128], index: 0, kind: input, shape index: {}]   ;;  %s1702_s1 = inlined_call_operand.hbm [shape: f32[128,256], index: 1, kind: input, shape index: {}]   ;;  %s1703_s2 = inlined_call_operand.hbm [shape: f32[1,256], index: 2, kind: input, shape index: {}]   ;;  %s1704_s3 = inlined_call_operand.vmem [shape: f32[1,128], index: 3, kind: input, shape index: {}]   ;;  %s1705_s4 = inlined_call_operand.vmem [shape: f32[1,128], index: 4, kind: input, shape index: {}]   ;;  %s1706_s5 = inlined_call_operand.hbm [shape: f32[128,128], index: 5, kind: input, shape index: {}]   ;;  %s1707_s6 = inlined_call_operand.vmem [shape: f32[1,128], index: 6, kind: input, shape index: {}]   ;;  %s1708_s7 = inlined_call_operand.hbm [shape: f32[16,128], index: 7, kind: output, shape index: {}]  }
   0x1   :  { %1711 = sst [smem:[#allocation15_spill]] %s1702_s1 }
   0x2   :  { %12 = vsyncpa [#allocation3], 0 }
   0x3   :  { %14 = vsyncpa [#allocation3 + $0x1], 0 }
   0x4   :  { %15 = vsyncpa [#allocation6], 0 }
   0x5   :  { %16 = vsyncpa [#allocation9], 0 }
   0x6   :  { %17 = vsyncpa [#allocation4], 0 }
   0x7   :  { %19 = vsyncpa [#allocation4 + $0x1], 0  ;;  %s1374_s24 = smov 0   ;;  %s1376_s25 = smov 0  }
   0x8   :  { %s1378_s26 = smov 0   ;;  %s1380_s27 = smov 0  }
   0x9 LB: > { %s1395_s28 = sadd.s32 4294967295, %s1325_s27   ;;  %s977_s29 = sadd.s32 4294967294, %s1325_s27   ;;  %s1325_s27 = sphi %s1380_s27, %s1725_s27   ;;  %s1321_s26 = sphi %s1378_s26, %s1724_s26   ;;  %s1317_s25 = sphi %s1376_s25, %s1723_s25   ;;  %s1313_s24 = sphi %s1374_s24, %s1722_s24  }
   0xa   : > { %p45_p0 = scmp.ne.s32.totalorder %s1317_s25, %s1313_s24  ;;  %p46_p1 = scmp.eq.s32.totalorder %s1395_s28, 0 }
   0xb   : > { %p195_p2 = scmp.eq.s32.totalorder %s1395_s28, 1  ;;  %p201_p3 = scmp.eq.s32.totalorder %s977_s29, 1 }
   0xc   : > { %p1404_p4 = por %p46_p1, %p45_p0  ;;  %p978_p5 = scmp.ge.s32.totalorder %s1325_s27, 1 }
   0xd   : > { %p1409_p6 = por %p201_p3, %p45_p0  ;;  %p208_p7 = scmp.lt.s32.totalorder %s1325_s27, 3 }
   0xe   : > { %s1714_s1 = sld [smem:[#allocation15_spill]]  ;;  %s1327_s13 = smov [#allocation5]  }
   0xf   : > { %p1417_p8 = pnand %p978_p5, %p208_p7  ;;  %s221_s14 = sshll.u32 %s1327_s13, 4  ;;  %s222_s14 = int_to_ptr.vmem [resolvable:$true] %s221_s14 }
  0x10   : > { %s234_s18 = sshll.u32 %s1703_s2, 4  ;;  %s1328_s19 = smov 256   ;;  %s235_s18 = int_to_ptr.hbm [resolvable:$true] %s234_s18 }
  0x11   : > { %p1029_p9 = pneg %p1417_p8  ;;  %s1329_s20 = smov 16  }
  0x12   : > { %s1330_s21 = smov [#allocation7]   ;;  %s251_s9 = sshll.u32 %s1706_s5, 4  ;;  %s252_s9 = int_to_ptr.hbm [resolvable:$true] %s251_s9 }
  0x13   : > { %p1425_p10 = pnand %p1029_p9, %p46_p1  ;;  %s236_s22 = sshll.u32 %s1330_s21, 4  ;;  %s237_s22 = int_to_ptr.vmem [resolvable:$true] %s236_s22 }
  0x14   : > { %s219_s11 = sshll.u32 %s1714_s1, 4  ;;  %s1331_s10 = smov [#allocation8]   ;;  %s220_s11 = int_to_ptr.hbm [resolvable:$true] %s219_s11 }
  0x15   : > { %1032 = dma.hbm_to_vmem [thread:$0]  (!%p1425_p10), %s220_s11, 4096, %s222_s14, [#allocation6], %s1328_s19, %s1328_s19, %s1329_s20  }
  0x16   : > { %1035 = dma.hbm_to_vmem [thread:$0]  (!%p1425_p10), %s235_s18, 32, %s237_s22, [#allocation6]  }
  0x17   : > { %s253_s11 = sshll.u32 %s1331_s10, 4  ;;  %s1709_s13 = smov 128   ;;  %s254_s11 = int_to_ptr.vmem [resolvable:$true] %s253_s11 }
  0x18   : > { %s1710_s14 = smov 8   ;;  %s1446_s16 = sadd.s32 1, %s1325_s27  }
  0x19   : > { %1038 = dma.hbm_to_vmem [thread:$0]  (!%p1425_p10), %s252_s9, 2048, %s254_s11, [#allocation9], %s1709_s13, %s1709_s13, %s1710_s14  }
  0x1a   : > { %s29_s17 = ssub.s32 %s1325_s27, %s1446_s16  ;;  %s32_s19 = sadd.s32 1, %s1321_s26 }
  0x1b   : > { %p30_p12 = scmp.eq.s32.totalorder %s29_s17, 0  ;;  %p39_p13 = scmp.ne.s32.totalorder %s1321_s26, %s1317_s25 }
  0x1c   : > { %p40_p0 = scmp.eq.s32.totalorder %s1325_s27, 0  ;;  %p1050_p5 = scmp.lt.s32.totalorder %s1325_s27, 2 }
  0x1d   : > { %s1455_s18 = scalar_select %p30_p12, %s1321_s26, %s32_s19  }
  0x1e   : > { %p1459_p3 = por %p195_p2, %p39_p13  ;;  %s270_s15 = sand.u32 1, %s1321_s26  }
  0x1f   : > { %s996_s21 = sshll.u32 %s1325_s27, 6  ;;  %p41_p7 = por %p40_p0, %p39_p13 }
  0x20   : > { %s983_s22 = sshll.u32 %s270_s15, 6  ;;  %s279_s9 = scalar_lea.hbm %s1701_s0, %s996_s21 }
  0x21   : > { %s280_s10 = sshll.u32 %s279_s9, 4  ;;  %s274_s11 = scalar_lea.vmem [#allocation2], %s983_s22  ;;  %s281_s10 = int_to_ptr.hbm [resolvable:$true] %s280_s10 }
  0x22   : > { %s282_s17 = sshll.u32 %s274_s11, 4  ;;  %p1469_p9 = pnand %p1050_p5, %p41_p7  ;;  %s283_s17 = int_to_ptr.vmem [resolvable:$true] %s282_s17 }
  0x23   : > { %s271_s13 = scalar_lea.sflag [#allocation3], %s270_s15  ;;  %s1221_s14 = sshra.s32 %s281_s10, 4  ;;  %s1222_s14 = int_to_ptr.hbm [resolvable:$true] %s1221_s14 }
  0x24   : > { %s1223_s1 = scalar_lea.hbm %s1222_s14, 64  ;;  %p1225_p10 = pneg %p1469_p9 }
  0x25   : > { %p1224_p2 = scmp.ne.s32.totalorder %s1222_s14, %s1223_s1  ;;  %s1228_s22 = scalar_lea.hbm %s1701_s0, 128 }
  0x26   : > { %p1229_p0 = scmp.lt.s32.totalorder %s1222_s14, %s1701_s0  ;;  %p1230_p5 = scmp.lt.s32.totalorder %s1228_s22, %s1223_s1 }
  0x27   : > { %p1226_p12 = pnand %p1225_p10, %p1224_p2 }
  0x28   : > { %p1231_p7 = por %p1230_p5, %p1229_p0 }
  0x29   : > { %p1227_p13 = pneg %p1226_p12 }
  0x2b   : > { %p1232_p11 = pnand %p1231_p7, %p1227_p13 }
  0x2d   : > { %1235 = shalt.err (!%p1232_p11)
}
  0x2e   : > { %s1719_s15 = smov 8   ;;  %s1720_s11 = smov 128  }
  0x2f   : > { %1042 = dma.hbm_to_vmem [thread:$0]  (!%p1469_p9), %s281_s10, 1024, %s283_s17, %s271_s13, %s1720_s11, %s1720_s11, %s1719_s15  }
  0x30   : > { %294 = sbr.rel (%p1417_p8) target bundleno = 449 (0x1c1), region = 48  ;;  %s1489_s21 = sand.u32 (!%p1417_p8), 1, %s1317_s25  }
  0x31   : > { %s987_s14 = sshll.u32 (!%p1417_p8), %s1489_s21, 6  ;;  %s297_s1 = scalar_lea.sflag (!%p1417_p8), [#allocation3], %s1489_s21 }
  0x32   : > { %s1493_s23 = scalar_lea.vmem (!%p1417_p8), [#allocation2], %s987_s14 }
  0x35   : > { %1296 = dma.done.wait (%p1404_p4), %s297_s1, 1024  }
  0x36   : > { %1298 = vsyncadd (%p1404_p4), %s297_s1, 4294966272 }
  0x37   : > { %1300 = dma.done.wait (%p46_p1), [#allocation6], 4128  }
  0x38   : > { %1302 = vsyncadd (%p46_p1), [#allocation6], 4294963168 }
  0x39   : > { %1304 = dma.done.wait (%p46_p1), [#allocation9], 2048  }
  0x3a   : > { %1306 = vsyncadd (%p46_p1), [#allocation9], 4294965248  ;;  %v386_v0 = vld [vmem:[#allocation5 + $0xf0] sm:$0xff]  ;;  %v387_v1 = vld [vmem:[#allocation5 + $0xf8] sm:$0xff]  ;;  %vm577_vm0 = vcmask 1041409   ;;  %vm580_vm1 = vcmask 1042434  }
  0x3b   : > { %v384_v2 = vld [vmem:[#allocation5 + $0xe0] sm:$0xff]  ;;  %394 = vmatpush.msra.mxu0 %v386_v0  ;;  %997 = vmatpush.msra.mxu3 %v386_v0  ;;  %v385_v3 = vld [vmem:[#allocation5 + $0xe8] sm:$0xff]  ;;  %v382_v4 = vld [vmem:[#allocation5 + $0xd0] sm:$0xff]  ;;  %vm583_vm2 = vcmask 1043459   ;;  %vm586_vm3 = vcmask 1044484   ;;  %vm589_vm4 = vcmask 1045509  }
  0x3c   : > { %435 = vmatpush.msra.mxu1 %v387_v1  ;;  %v383_v5 = vld [vmem:[#allocation5 + $0xd8] sm:$0xff]  ;;  %v380_v6 = vld [vmem:[#allocation5 + $0xc0] sm:$0xff]  ;;  %v381_v7 = vld [vmem:[#allocation5 + $0xc8] sm:$0xff]  ;;  %vm592_vm5 = vcmask 1046534   ;;  %vm595_vm6 = vcmask 1047559   ;;  %s991_s17 = sshll.u32 %s1489_s21, 3 }
  0x3d   : > { %395 = vmatpush.msra.mxu0 %v384_v2  ;;  %998 = vmatpush.msra.mxu3 %v384_v2  ;;  %v378_v8 = vld [vmem:[#allocation5 + $0xb0] sm:$0xff]  ;;  %v379_v9 = vld [vmem:[#allocation5 + $0xb8] sm:$0xff]  ;;  %v376_v10 = vld [vmem:[#allocation5 + $0xa0] sm:$0xff]  ;;  %s993_s19 = sshll.u32 %s1395_s28, 3  ;;  %s346_s14 = scalar_lea.vmem [#allocation10], %s991_s17 }
  0x3e   : > { %436 = vmatpush.msra.mxu1 %v385_v3  ;;  %v377_v11 = vld [vmem:[#allocation5 + $0xa8] sm:$0xff]  ;;  %v374_v12 = vld [vmem:[#allocation5 + $0x90] sm:$0xff]  ;;  %v375_v13 = vld [vmem:[#allocation5 + $0x98] sm:$0xff]  ;;  %s873_s9 = scalar_lea.hbm %s1708_s7, %s993_s19  ;;  %s875_s1 = sshll.u32 %s346_s14, 4  ;;  %s876_s1 = int_to_ptr.vmem [resolvable:$true] %s875_s1 }
  0x3f   : > { %396 = vmatpush.msra.mxu0 %v382_v4  ;;  %999 = vmatpush.msra.mxu3 %v382_v4  ;;  %v372_v14 = vld [vmem:[#allocation5 + $0x80] sm:$0xff]  ;;  %v373_v15 = vld [vmem:[#allocation5 + $0x88] sm:$0xff]  ;;  %v370_v16 = vld [vmem:[#allocation5 + $0x70] sm:$0xff]  ;;  %s863_s30 = scalar_lea.sflag [#allocation4], %s1489_s21  ;;  %s1271_s19 = scalar_lea.hbm %s1708_s7, 16 }
  0x40   : > { %437 = vmatpush.msra.mxu1 %v383_v5  ;;  %v371_v17 = vld [vmem:[#allocation5 + $0x78] sm:$0xff]  ;;  %v368_v18 = vld [vmem:[#allocation5 + $0x60] sm:$0xff]  ;;  %v369_v19 = vld [vmem:[#allocation5 + $0x68] sm:$0xff] }
  0x41   : > { %397 = vmatpush.msra.mxu0 %v380_v6  ;;  %1000 = vmatpush.msra.mxu3 %v380_v6  ;;  %v366_v20 = vld [vmem:[#allocation5 + $0x50] sm:$0xff]  ;;  %v367_v21 = vld [vmem:[#allocation5 + $0x58] sm:$0xff]  ;;  %v364_v22 = vld [vmem:[#allocation5 + $0x40] sm:$0xff] }
  0x42   : > { %438 = vmatpush.msra.mxu1 %v381_v7  ;;  %v365_v23 = vld [vmem:[#allocation5 + $0x48] sm:$0xff]  ;;  %v362_v24 = vld [vmem:[#allocation5 + $0x30] sm:$0xff]  ;;  %v363_v25 = vld [vmem:[#allocation5 + $0x38] sm:$0xff] }
  0x43   : > { %398 = vmatpush.msra.mxu0 %v378_v8  ;;  %1001 = vmatpush.msra.mxu3 %v378_v8  ;;  %v360_v26 = vld [vmem:[#allocation5 + $0x20] sm:$0xff]  ;;  %v361_v27 = vld [vmem:[#allocation5 + $0x28] sm:$0xff]  ;;  %v358_v28 = vld [vmem:[#allocation5 + $0x10] sm:$0xff] }
  0x44   : > { %439 = vmatpush.msra.mxu1 %v379_v9  ;;  %v359_v29 = vld [vmem:[#allocation5 + $0x18] sm:$0xff]  ;;  %v356_v30 = vld [vmem:[#allocation5] sm:$0xff]  ;;  %v357_v31 = vld [vmem:[#allocation5 + $0x8] sm:$0xff] }
  0x45   : > { %399 = vmatpush.msra.mxu0 %v376_v10  ;;  %1002 = vmatpush.msra.mxu3 %v376_v10  ;;  %v348_v32 = vld [vmem:[%s1493_s23] sm:$0xff]  ;;  %v353_v33 = vld [vmem:[%s1493_s23 + $0x28] sm:$0xff]  ;;  %v354_v35 = vld [vmem:[%s1493_s23 + $0x30] sm:$0xff] }
  0x46   : > { %440 = vmatpush.msra.mxu1 %v377_v11  ;;  %v349_v34 = vld [vmem:[%s1493_s23 + $0x8] sm:$0xff]  ;;  %v350_v36 = vld [vmem:[%s1493_s23 + $0x10] sm:$0xff]  ;;  %v355_v37 = vld [vmem:[%s1493_s23 + $0x38] sm:$0xff] }
  0x47   : > { %400 = vmatpush.msra.mxu0 %v374_v12  ;;  %1003 = vmatpush.msra.mxu3 %v374_v12  ;;  %v351_v38 = vld [vmem:[%s1493_s23 + $0x18] sm:$0xff]  ;;  %v352_v39 = vld [vmem:[%s1493_s23 + $0x20] sm:$0xff]  ;;  %s877_s23 = sshll.u32 %s873_s9, 4  ;;  %s878_s23 = int_to_ptr.hbm [resolvable:$true] %s877_s23 }
  0x48   : > { %441 = vmatpush.msra.mxu1 %v375_v13  ;;  %v1515_v40 = vld [vmem:[#allocation7] sm:$0x3]  ;;  %s1265_s12 = sshra.s32 %s878_s23, 4  ;;  %s1266_s12 = int_to_ptr.hbm [resolvable:$true] %s1265_s12 }
  0x49   : > { %401 = vmatpush.msra.mxu0 %v372_v14  ;;  %1004 = vmatpush.msra.mxu3 %v372_v14  ;;  %v1518_v41 = vperm.slane %v1515_v40, 0  ;;  %v1533_v56 = vld [vmem:[%s1704_s3] ss:$0 sm:$0xff]  ;;  %s1267_s28 = scalar_lea.hbm %s1266_s12, 8  ;;  %p1272_p11 = scmp.lt.s32.totalorder %s1266_s12, %s1708_s7 }
  0x4a   : > { %442 = vmatpush.msra.mxu1 %v373_v15  ;;  %p1268_p1 = scmp.ne.s32.totalorder %s1266_s12, %s1267_s28  ;;  %p1273_p9 = scmp.lt.s32.totalorder %s1271_s19, %s1267_s28 }
  0x4b   : > { %402 = vmatpush.msra.mxu0 %v370_v16  ;;  %1005 = vmatpush.msra.mxu3 %v370_v16 }
  0x4c   : > { %443 = vmatpush.msra.mxu1 %v371_v17  ;;  %p1269_p4 = pnand %p1268_p1, %p1459_p3  ;;  %p1274_p2 = por %p1273_p9, %p1272_p11 }
  0x4d   : > { %403 = vmatpush.msra.mxu0 %v368_v18  ;;  %1006 = vmatpush.msra.mxu3 %v368_v18 }
  0x4e   : > { %444 = vmatpush.msra.mxu1 %v369_v19  ;;  %p1270_p8 = pneg %p1269_p4 }
  0x4f   : > { %404 = vmatpush.msra.mxu0 %v366_v20  ;;  %1007 = vmatpush.msra.mxu3 %v366_v20 }
  0x50   : > { %445 = vmatpush.msra.mxu1 %v367_v21  ;;  %p1275_p10 = pnand %p1274_p2, %p1270_p8 }
  0x51   : > { %405 = vmatpush.msra.mxu0 %v364_v22  ;;  %1008 = vmatpush.msra.mxu3 %v364_v22 }
  0x52   : > { %446 = vmatpush.msra.mxu1 %v365_v23 }
  0x53   : > { %406 = vmatpush.msra.mxu0 %v362_v24  ;;  %1009 = vmatpush.msra.mxu3 %v362_v24 }
  0x54   : > { %447 = vmatpush.msra.mxu1 %v363_v25 }
  0x55   : > { %407 = vmatpush.msra.mxu0 %v360_v26  ;;  %1010 = vmatpush.msra.mxu3 %v360_v26 }
  0x56   : > { %448 = vmatpush.msra.mxu1 %v361_v27 }
  0x57   : > { %408 = vmatpush.msra.mxu0 %v358_v28  ;;  %1011 = vmatpush.msra.mxu3 %v358_v28 }
  0x58   : > { %449 = vmatpush.msra.mxu1 %v359_v29 }
  0x59   : > { %409 = vmatpush.msra.mxu0 %v356_v30  ;;  %1012 = vmatpush.msra.mxu3 %v356_v30 }
  0x5a   : > { %450 = vmatpush.msra.mxu1 %v357_v31  ;;  %410 = vmatmul.f32.vlgmr.msra.gmra.mxu0 %v348_v32 }
  0x5b   : > { %425 = vmatmul.f32.vlgmr.msra.gmra.mxu3 %v353_v33  ;;  %451 = vmatmul.f32.vlgmr.msra.gmra.mxu1 %v348_v32 }
  0x62   : > { %413 = vmatmul.f32.gmra.mxu0 %v349_v34 }
  0x63   : > { %428 = vmatmul.f32.gmra.mxu3 %v354_v35  ;;  %454 = vmatmul.f32.gmra.mxu1 %v349_v34 }
  0x6a   : > { %416 = vmatmul.f32.gmra.mxu0 %v350_v36 }
  0x6b   : > { %431 = vmatmul.f32.gmra.mxu3 %v355_v37  ;;  %457 = vmatmul.f32.gmra.mxu1 %v350_v36 }
  0x72   : > { %419 = vmatmul.f32.gmra.mxu0 %v351_v38 }
  0x73   : > { %460 = vmatmul.f32.gmra.mxu1 %v351_v38 }
  0x7a   : > { %422 = vmatmul.f32.gmra.mxu0 %v352_v39 }
  0x7b   : > { %463 = vmatmul.f32.gmra.mxu1 %v352_v39 }
  0x83   : > { %466 = vmatmul.f32.gmra.mxu1 %v353_v33 }
  0x8b   : > { %469 = vmatmul.f32.gmra.mxu1 %v354_v35 }
  0x93   : > { %472 = vmatmul.f32.gmra.mxu1 %v355_v37 }
  0xd7   : > { %v411_v42 = vpop.f32.mrf.mxu0 }
  0xd8   : > { %v412_v43 = vadd.f32 %v411_v42, %v1518_v41  ;;  %v1521_v44 = vpop.f32.mrf.mxu1 }
  0xda   : > { %v477_v45 = vrot.slane %v412_v43, 4 }
  0xdc   : > { %v478_v46 = vmax.f32 %v412_v43, %v477_v45 }
  0xde   : > { %v479_v47 = vrot.slane %v478_v46, 2  ;;  %v426_v48 = vpop.f32.mrf.mxu3 }
  0xdf   : > { %v1524_v49 = vadd.f32 %v426_v48, %v1518_v41  ;;  %v414_v50 = vpop.f32.mrf.mxu0 }
  0xe0   : > { %v480_v51 = vmax.f32 %v478_v46, %v479_v47  ;;  %v415_v52 = vadd.f32 %v414_v50, %v1518_v41  ;;  %v1527_v53 = vpop.f32.mrf.mxu1  ;;  %v1569_v50 = vperm.slane %v1515_v40, 1 }
  0xe1   : > { %v507_v54 = vrot.slane %v1524_v49, 4 }
  0xe2   : > { %v481_v55 = vrot.slane %v480_v51, 1  ;;  %v483_v57 = vrot.slane %v415_v52, 4  ;;  %v453_v40 = vadd.f32 %v1521_v44, %v1569_v50 }
  0xe3   : > { %v508_v58 = vmax.f32 %v1524_v49, %v507_v54 }
  0xe4   : > { %v482_v59 = vmax.f32 %v480_v51, %v481_v55  ;;  %v484_v60 = vmax.f32 %v415_v52, %v483_v57 }
  0xe5   : > { %v509_v61 = vrot.slane %v508_v58, 2 }
  0xe6   : > { %v1537_v62 = vmax.f32 %v482_v59, %v1533_v56  ;;  %v485_v63 = vrot.slane %v484_v60, 2  ;;  %v429_v0 = vpop.f32.mrf.mxu3 }
  0xe7   : > { %v1540_v1 = vadd.f32 %v429_v0, %v1518_v41  ;;  %v417_v2 = vpop.f32.mrf.mxu0  ;;  %v510_v7 = vmax.f32 %v508_v58, %v509_v61 }
  0xe8   : > { %v486_v3 = vmax.f32 %v484_v60, %v485_v63  ;;  %v418_v4 = vadd.f32 %v417_v2, %v1518_v41  ;;  %v1543_v5 = vpop.f32.mrf.mxu1  ;;  %v536_v6 = vperm.slane %v1537_v62, 0 }
  0xe9   : > { %v513_v8 = vrot.slane %v1540_v1, 4  ;;  %v511_v15 = vrot.slane %v510_v7, 1 }
  0xea   : > { %v487_v9 = vrot.slane %v486_v3, 1  ;;  %v489_v10 = vrot.slane %v418_v4, 4  ;;  %v544_v14 = vsub.f32 %v412_v43, %v536_v6 }
  0xeb   : > { %v514_v11 = vmax.f32 %v1540_v1, %v513_v8  ;;  %v512_v27 = vmax.f32 %v510_v7, %v511_v15  ;;  %v813_v8 = vld [vmem:[#allocation8 + $0x78] sm:$0xff] }
  0xec   : > { %v488_v12 = vmax.f32 %v486_v3, %v487_v9  ;;  %v490_v13 = vmax.f32 %v418_v4, %v489_v10  ;;  %v552_v26 = vmul.f32 1.442695, %v544_v14  ;;  %841 = vmatpush.msra.mxu2 %v813_v8 }
  0xed   : > { %v515_v16 = vrot.slane %v514_v11, 2  ;;  %v1561_v36 = vmax.f32 %v512_v27, %v1533_v56 }
  0xee   : > { %v491_v17 = vrot.slane %v490_v13, 2  ;;  %v432_v18 = vpop.f32.mrf.mxu3  ;;  %v1552_v22 = vmax.f32 %v488_v12, %v1533_v56  ;;  %1097 = vpow2.f32 %v552_v26 }
  0xef   : > { %v516_v19 = vmax.f32 %v514_v11, %v515_v16  ;;  %v1549_v20 = vadd.f32 %v432_v18, %v1518_v41  ;;  %v420_v21 = vpop.f32.mrf.mxu0  ;;  %v541_v51 = vperm.slane %v1561_v36, 0 }
  0xf0   : > { %v492_v23 = vmax.f32 %v490_v13, %v491_v17  ;;  %v421_v24 = vadd.f32 %v420_v21, %v1518_v41  ;;  %v1555_v25 = vpop.f32.mrf.mxu1  ;;  %v537_v33 = vperm.slane %v1552_v22, 0  ;;  %v811_v17 = vld [vmem:[#allocation8 + $0x68] sm:$0xff] }
  0xf1   : > { %v519_v28 = vrot.slane %v1549_v20, 4  ;;  %v517_v29 = vrot.slane %v516_v19, 1  ;;  %v549_v0 = vsub.f32 %v1524_v49, %v541_v51  ;;  %v812_v49 = vld [vmem:[#allocation8 + $0x70] sm:$0xff] }
  0xf2   : > { %v493_v30 = vrot.slane %v492_v23, 1  ;;  %v495_v31 = vrot.slane %v421_v24, 4  ;;  %v545_v45 = vsub.f32 %v415_v52, %v537_v33  ;;  %842 = vmatpush.msra.mxu2 %v812_v49  ;;  %v459_v33 = vadd.f32 %v1543_v5, %v1569_v50 }
  0xf3   : > { %v520_v32 = vmax.f32 %v1549_v20, %v519_v28  ;;  %v518_v37 = vmax.f32 %v516_v19, %v517_v29  ;;  %v562_v12 = vmul.f32 1.442695, %v549_v0 }
  0xf4   : > { %v494_v34 = vmax.f32 %v492_v23, %v493_v30  ;;  %v496_v35 = vmax.f32 %v421_v24, %v495_v31  ;;  %v1098_v52 = vpop.eup %1097  ;;  %v554_v60 = vmul.f32 1.442695, %v545_v45  ;;  %843 = vmatpush.msra.mxu2 %v811_v17  ;;  %v810_v23 = vld [vmem:[#allocation8 + $0x60] sm:$0xff]  ;;  %v576_v30 = vrot.slane %v1552_v22, 7 }
  0xf5   : > { %v521_v39 = vrot.slane %v520_v32, 2  ;;  %v1576_v55 = vmax.f32 %v518_v37, %v1533_v56  ;;  %v601_v9 = vrot.slane %v1098_v52, 4  ;;  %v673_v10 = vmul.f32 %v1098_v52, %v453_v40 }
  0xf6   : > { %v1564_v38 = vmax.f32 %v494_v34, %v1533_v56  ;;  %v497_v42 = vrot.slane %v496_v35, 2  ;;  %1099 = vpow2.f32 %v554_v60  ;;  %844 = vmatpush.msra.mxu2 %v810_v23  ;;  %v808_v34 = vld [vmem:[#allocation8 + $0x50] sm:$0xff]  ;;  %v1603_v22 = vadd.f32 %v1555_v25, %v1569_v50 }
  0xf7   : > { %v423_v43 = vpop.f32.mrf.mxu0  ;;  %v522_v46 = vmax.f32 %v520_v32, %v521_v39  ;;  %v602_v18 = vadd.f32 %v1098_v52, %v601_v9  ;;  %v681_v21 = vrot.slane %v673_v10, 4  ;;  %1101 = vpow2.f32 %v562_v12 }
  0xf8   : > { %v498_v47 = vmax.f32 %v496_v35, %v497_v42  ;;  %v1566_v48 = vpop.f32.mrf.mxu1  ;;  %v1573_v54 = vadd.f32 %v423_v43, %v1518_v41  ;;  %v538_v57 = vperm.slane %v1564_v38, 0  ;;  %v542_v41 = vperm.slane %v1576_v55, 0  ;;  %v807_v42 = vld [vmem:[#allocation8 + $0x48] sm:$0xff] }
  0xf9   : > { %v523_v58 = vrot.slane %v522_v46, 1  ;;  %v456_v32 = vadd.f32 %v1527_v53, %v1569_v50  ;;  %v588_v35 = vrot.slane %v1561_v36, 3  ;;  %v578_v53 = vsel %vm577_vm0, %v576_v30, %v1537_v62  ;;  %v806_v36 = vld [vmem:[#allocation8 + $0x40] sm:$0xff] }
  0xfa   : > { %v499_v59 = vrot.slane %v498_v47, 1  ;;  %v501_v2 = vrot.slane %v1573_v54, 4  ;;  %v546_v3 = vsub.f32 %v418_v4, %v538_v57  ;;  %v550_v14 = vsub.f32 %v1540_v1, %v542_v41  ;;  %v809_v1 = vld [vmem:[#allocation8 + $0x58] sm:$0xff] }
  0xfb   : > { %v524_v61 = vmax.f32 %v522_v46, %v523_v58  ;;  %845 = vmatpush.msra.mxu2 %v809_v1  ;;  %v579_v5 = vrot.slane %v1564_v38, 6  ;;  %v591_v60 = vrot.slane %v1576_v55, 2  ;;  %v1616_v40 = vadd.f32 %v1566_v48, %v1569_v50  ;;  %v801_v1 = vld [vmem:[#allocation8 + $0x18] sm:$0xff] }
  0xfc   : > { %v500_v63 = vmax.f32 %v498_v47, %v499_v59  ;;  %v502_v4 = vmax.f32 %v1573_v54, %v501_v2  ;;  %v556_v15 = vmul.f32 1.442695, %v546_v3  ;;  %v1100_v29 = vpop.eup %1099  ;;  %v564_v31 = vmul.f32 1.442695, %v550_v14  ;;  %v804_v3 = vld [vmem:[#allocation8 + $0x30] sm:$0xff] }
  0xfd   : > { %v1585_v6 = vmax.f32 %v524_v61, %v1533_v56  ;;  %v607_v43 = vrot.slane %v1100_v29, 4  ;;  %v674_v45 = vmul.f32 %v1100_v29, %v456_v32  ;;  %846 = vmatpush.msra.mxu2 %v808_v34  ;;  %v1102_v51 = vpop.eup %1101  ;;  %v805_v61 = vld [vmem:[#allocation8 + $0x38] sm:$0xff] }
  0xfe   : > { %v1588_v7 = vmax.f32 %v500_v63, %v1533_v56  ;;  %v503_v19 = vrot.slane %v502_v4, 2  ;;  %1103 = vpow2.f32 %v556_v15  ;;  %v631_v0 = vrot.slane %v1102_v51, 4 }
  0xff   : > { %v543_v13 = vperm.slane %v1585_v6, 0  ;;  %847 = vmatpush.msra.mxu2 %v807_v42  ;;  %v608_v38 = vadd.f32 %v1100_v29, %v607_v43  ;;  %v687_v63 = vrot.slane %v674_v45, 4  ;;  %v594_v29 = vrot.slane %v1585_v6, 1 }
 0x100   : > { %v539_v44 = vperm.slane %v1588_v7, 0  ;;  %v467_v11 = vpop.f32.mrf.mxu1  ;;  %v504_v28 = vmax.f32 %v502_v4, %v503_v19  ;;  %v582_v25 = vrot.slane %v1588_v7, 5  ;;  %v581_v7 = vsel %vm580_vm1, %v579_v5, %v578_v53 }
 0x101   : > { %v551_v26 = vsub.f32 %v1549_v20, %v543_v13  ;;  %v682_v20 = vadd.f32 %v681_v21, %v673_v10  ;;  %v468_v58 = vadd.f32 %v467_v11, %v1569_v50  ;;  %848 = vmatpush.msra.mxu2 %v806_v36  ;;  %v803_v13 = vld [vmem:[#allocation8 + $0x28] sm:$0xff]  ;;  %v609_v14 = vrot.slane %v608_v38, 2  ;;  %v802_v21 = vld [vmem:[#allocation8 + $0x20] sm:$0xff] }
 0x102   : > { %v547_v16 = vsub.f32 %v421_v24, %v539_v44  ;;  %v603_v24 = vrot.slane %v602_v18, 2  ;;  %v505_v37 = vrot.slane %v504_v28, 1  ;;  %v584_v44 = vsel %vm583_vm2, %v582_v25, %v581_v7 }
 0x103   : > { %v566_v46 = vmul.f32 1.442695, %v551_v26  ;;  %v683_v52 = vrot.slane %v682_v20, 2  ;;  %v678_v10 = vmul.f32 %v1102_v51, %v468_v58  ;;  %849 = vmatpush.msra.mxu2 %v805_v61  ;;  %v688_v15 = vadd.f32 %v687_v63, %v674_v45 }
 0x104   : > { %v558_v27 = vmul.f32 1.442695, %v547_v16  ;;  %v506_v47 = vmax.f32 %v504_v28, %v505_v37  ;;  %v1608_v57 = vadd.f32 %v603_v24, %v602_v18  ;;  %v1104_v59 = vpop.eup %1103  ;;  %v632_v32 = vadd.f32 %v1102_v51, %v631_v0 }
 0x105   : > { %v613_v9 = vrot.slane %v1104_v59, 4  ;;  %v1621_v49 = vadd.f32 %v683_v52, %v682_v20  ;;  %850 = vmatpush.msra.mxu2 %v804_v3  ;;  %v675_v17 = vmul.f32 %v1104_v59, %v459_v33  ;;  %v711_v28 = vrot.slane %v678_v10, 4 }
 0x106   : > { %1105 = vpow2.f32 %v558_v27  ;;  %v532_v62 = vmax.f32 %v506_v47, %v1533_v56  ;;  %v605_v55 = vrot.slane %v1608_v57, 1  ;;  %v610_v33 = vadd.f32 %v609_v14, %v608_v38  ;;  %v799_v47 = vld [vmem:[#allocation8 + $0x8] sm:$0xff] }
 0x107   : > { %1107 = vpow2.f32 %v564_v31  ;;  %851 = vmatpush.msra.mxu2 %v803_v13  ;;  %v689_v45 = vrot.slane %v688_v15, 2  ;;  %v685_v51 = vrot.slane %v1621_v49, 1 }
 0x108   : > { %v470_v39 = vpop.f32.mrf.mxu1  ;;  %1109 = vpow2.f32 %v566_v46  ;;  %v540_v2 = vperm.slane %v532_v62, 0  ;;  %v585_v41 = vrot.slane %v532_v62, 4  ;;  %v606_v43 = vadd.f32 %v605_v55, %v1608_v57  ;;  %v798_v62 = vld [vmem:[#allocation8] sm:$0xff] }
 0x109   : > { %v471_v12 = vadd.f32 %v470_v39, %v1569_v50  ;;  %852 = vmatpush.msra.mxu2 %v802_v21  ;;  %v800_v39 = vld [vmem:[#allocation8 + $0x10] sm:$0xff]  ;;  %v712_v46 = vadd.f32 %v711_v28, %v678_v10  ;;  %v611_v25 = vrot.slane %v610_v33, 1  ;;  %v1635_v61 = vadd.f32 %v689_v45, %v688_v15 }
 0x10a   : > { %v548_v48 = vsub.f32 %v1573_v54, %v540_v2  ;;  %v587_v4 = vsel %vm586_vm3, %v585_v41, %v584_v44  ;;  %v614_v54 = vadd.f32 %v1104_v59, %v613_v9  ;;  %v633_v59 = vrot.slane %v632_v32, 2 }
 0x10b   : > { %v590_v23 = vsel %vm589_vm4, %v588_v35, %v587_v4  ;;  %v693_v35 = vrot.slane %v675_v17, 4  ;;  %853 = vmatpush.msra.mxu2 %v801_v1  ;;  %v713_v2 = vrot.slane %v712_v46, 2  ;;  %v612_v13 = vadd.f32 %v611_v25, %v610_v33 }
 0x10c   : > { %v1106_v8 = vpop.eup %1105  ;;  %v560_v19 = vmul.f32 1.442695, %v548_v48  ;;  %v593_v24 = vsel %vm592_vm5, %v591_v60, %v590_v23  ;;  %v634_v48 = vadd.f32 %v633_v59, %v632_v32  ;;  %v691_v4 = vrot.slane %v1635_v61, 1 }
 0x10d   : > { %v1108_v11 = vpop.eup %1107  ;;  %v619_v18 = vrot.slane %v1106_v8, 4  ;;  %v676_v34 = vmul.f32 %v1106_v8, %v1603_v22  ;;  %v596_v20 = vsel %vm595_vm6, %v594_v29, %v593_v24  ;;  %854 = vmatpush.msra.mxu2 %v800_v39 }
 0x10e   : > { %v1110_v26 = vpop.eup %1109  ;;  %v637_v27 = vrot.slane %v1108_v11, 4  ;;  %1111 = vpow2.f32 %v560_v19  ;;  %v679_v30 = vmul.f32 %v1108_v11, %v471_v12  ;;  %v598_v42 = vsub.f32 %v1533_v56, %v596_v20 }
 0x10f   : > { %v620_v37 = vadd.f32 %v1106_v8, %v619_v18  ;;  %v643_v6 = vrot.slane %v1110_v26, 4  ;;  %v699_v58 = vrot.slane %v676_v34, 4  ;;  %v694_v56 = vadd.f32 %v693_v35, %v675_v17  ;;  %855 = vmatpush.msra.mxu2 %v799_v47 }
 0x110   : > { %v473_v16 = vpop.f32.mrf.mxu1  ;;  %v717_v53 = vrot.slane %v679_v30, 4  ;;  %v599_v36 = vmul.f32 1.442695, %v598_v42  ;;  %v638_v22 = vadd.f32 %v1108_v11, %v637_v27  ;;  %v1639_v8 = vadd.f32 %v685_v51, %v1621_v49 }
 0x111   : > { %v474_v31 = vadd.f32 %v473_v16, %v1569_v50  ;;  %v615_v50 = vrot.slane %v614_v54, 2  ;;  %v621_v60 = vrot.slane %v620_v37, 2  ;;  %v644_v57 = vadd.f32 %v1110_v26, %v643_v6  ;;  %856 = vmatpush.msra.mxu2 %v798_v62 }
 0x112   : > { %1113 = vpow2.f32 %v599_v36  ;;  %v718_v41 = vadd.f32 %v717_v53, %v679_v30  ;;  %v639_v7 = vrot.slane %v638_v22, 2  ;;  %v700_v55 = vadd.f32 %v699_v58, %v676_v34 }
 0x113   : > { %v680_v5 = vmul.f32 %v1110_v26, %v474_v31  ;;  %v616_v38 = vadd.f32 %v615_v50, %v614_v54  ;;  %v695_v44 = vrot.slane %v694_v56, 2  ;;  %v622_v11 = vadd.f32 %v621_v60, %v620_v37 }
 0x114   : > { %v1112_v52 = vpop.eup %1111  ;;  %v645_v12 = vrot.slane %v644_v57, 2  ;;  %v714_v16 = vadd.f32 %v713_v2, %v712_v46  ;;  %v719_v17 = vrot.slane %v718_v41, 2  ;;  %v640_v19 = vadd.f32 %v639_v7, %v638_v22  ;;  %v1095_v46 = vld [vmem:[%s1705_s4] ss:$0 sm:$0xff] }
 0x115   : > { %v625_v63 = vrot.slane %v1112_v52, 4  ;;  %v677_v0 = vmul.f32 %v1112_v52, %v1616_v40  ;;  %v723_v3 = vrot.slane %v680_v5, 4  ;;  %v617_v40 = vrot.slane %v616_v38, 1 }
 0x116   : > { %v701_v49 = vrot.slane %v700_v55, 2  ;;  %v696_v27 = vadd.f32 %v695_v44, %v694_v56  ;;  %v623_v54 = vrot.slane %v622_v11, 1  ;;  %v635_v28 = vrot.slane %v634_v48, 1 }
 0x117   : > { %v626_v9 = vadd.f32 %v1112_v52, %v625_v63  ;;  %v705_v10 = vrot.slane %v677_v0, 4  ;;  %v724_v18 = vadd.f32 %v723_v3, %v680_v5  ;;  %v646_v29 = vadd.f32 %v645_v12, %v644_v57 }
 0x118   : > { %v1114_v15 = vpop.eup %1113  ;;  %v618_v30 = vadd.f32 %v617_v40, %v616_v38  ;;  %v720_v32 = vadd.f32 %v719_v17, %v718_v41  ;;  %v702_v35 = vadd.f32 %v701_v49, %v700_v55  ;;  %v641_v42 = vrot.slane %v640_v19, 1 }
 0x119   : > { %v627_v14 = vrot.slane %v626_v9, 2  ;;  %v706_v21 = vadd.f32 %v705_v10, %v677_v0  ;;  %v650_v26 = vrot.slane %v1114_v15, 1  ;;  %v651_v1 = vrot.slane %v1114_v15, 2 }
 0x11a   : > { %v665_v24 = vadd.f32 %v1114_v15, %v606_v43  ;;  %v725_v33 = vrot.slane %v724_v18, 2  ;;  %v652_v34 = vrot.slane %v1114_v15, 3  ;;  %v624_v6 = vadd.f32 %v623_v54, %v622_v11 }
 0x11b   : > { %v628_v23 = vadd.f32 %v627_v14, %v626_v9  ;;  %v666_v20 = vadd.f32 %v650_v26, %v612_v13  ;;  %v707_v37 = vrot.slane %v706_v21, 2  ;;  %v647_v45 = vrot.slane %v646_v29, 1 }
 0x11c   : > { %v654_v50 = vrot.slane %v1114_v15, 5  ;;  %1115 = vrcp.f32 %v665_v24  ;;  %v653_v53 = vrot.slane %v1114_v15, 4  ;;  %v655_v5 = vrot.slane %v1114_v15, 6 }
 0x11d   : > { %v629_v31 = vrot.slane %v628_v23, 1  ;;  %v667_v47 = vadd.f32 %v651_v1, %v618_v30  ;;  %1117 = vrcp.f32 %v666_v20  ;;  %v726_v43 = vadd.f32 %v725_v33, %v724_v18 }
 0x11e   : > { %v636_v36 = vadd.f32 %v635_v28, %v634_v48  ;;  %v656_v22 = vrot.slane %v1114_v15, 7  ;;  %v668_v51 = vadd.f32 %v652_v34, %v624_v6  ;;  %v708_v25 = vadd.f32 %v707_v37, %v706_v21 }
 0x11f   : > { %v630_v39 = vadd.f32 %v629_v31, %v628_v23  ;;  %v715_v58 = vrot.slane %v714_v16, 1  ;;  %v642_v59 = vadd.f32 %v641_v42, %v640_v19  ;;  %v697_v56 = vrot.slane %v696_v27, 1 }
 0x120   : > { %v648_v60 = vadd.f32 %v647_v45, %v646_v29  ;;  %v670_v62 = vadd.f32 %v654_v50, %v636_v36  ;;  %v1645_v57 = vmul.f32 %v1114_v15, %v1095_v46  ;;  %v703_v38 = vrot.slane %v702_v35, 1 }
 0x121   : > { %v669_v52 = vadd.f32 %v653_v53, %v630_v39  ;;  %v721_v63 = vrot.slane %v720_v32, 1  ;;  %v671_v0 = vadd.f32 %v655_v5, %v642_v59  ;;  %1119 = vrcp.f32 %v667_v47 }
 0x122   : > { %v1116_v2 = vpop.eup %1115  ;;  %v692_v41 = vadd.f32 %v691_v4, %v1635_v61  ;;  %v727_v3 = vrot.slane %v726_v43, 1  ;;  %v672_v7 = vadd.f32 %v656_v22, %v648_v60  ;;  %1121 = vrcp.f32 %v668_v51 }
 0x123   : > { %v1118_v55 = vpop.eup %1117  ;;  %v709_v9 = vrot.slane %v708_v25, 1  ;;  %v716_v10 = vadd.f32 %v715_v58, %v714_v16  ;;  %1123 = vrcp.f32 %v669_v52  ;;  %v766_v44 = vmul.f32 %v1116_v2, %v665_v24 }
 0x124   : > { %v698_v11 = vadd.f32 %v697_v56, %v696_v27  ;;  %v735_v48 = vrot.slane %v1645_v57, 1  ;;  %1125 = vrcp.f32 %v670_v62  ;;  %v767_v12 = vmul.f32 %v1118_v55, %v666_v20 }
 0x125   : > { %v704_v13 = vadd.f32 %v703_v38, %v702_v35  ;;  %v722_v40 = vadd.f32 %v721_v63, %v720_v32  ;;  %1127 = vrcp.f32 %v671_v0  ;;  %v774_v14 = vsub.f32 2.0, %v766_v44 }
 0x126   : > { %v728_v15 = vadd.f32 %v727_v3, %v726_v43  ;;  %v736_v61 = vrot.slane %v1645_v57, 2  ;;  %1129 = vrcp.f32 %v672_v7  ;;  %v775_v4 = vsub.f32 2.0, %v767_v12 }
 0x127   : > { %v1120_v17 = vpop.eup %1119  ;;  %v710_v18 = vadd.f32 %v709_v9, %v708_v25  ;;  %v737_v16 = vrot.slane %v1645_v57, 3  ;;  %v738_v19 = vrot.slane %v1645_v57, 4  ;;  %v739_v49 = vrot.slane %v1645_v57, 5 }
 0x128   : > { %v1122_v21 = vpop.eup %1121  ;;  %v740_v23 = vrot.slane %v1645_v57, 6  ;;  %v751_v26 = vadd.f32 %v735_v48, %v692_v41  ;;  %v768_v27 = vmul.f32 %v1120_v17, %v667_v47  ;;  %v783_v54 = vmul.f32 %v1118_v55, %v775_v4 }
 0x129   : > { %v1124_v28 = vpop.eup %1123  ;;  %v741_v29 = vrot.slane %v1645_v57, 7  ;;  %v750_v30 = vadd.f32 %v1645_v57, %v1639_v8  ;;  %v769_v31 = vmul.f32 %v1122_v21, %v668_v51  ;;  %v782_v1 = vmul.f32 %v1116_v2, %v774_v14 }
 0x12a   : > { %v1126_v24 = vpop.eup %1125  ;;  %v752_v32 = vadd.f32 %v736_v61, %v698_v11  ;;  %v770_v33 = vmul.f32 %v1124_v28, %v669_v52  ;;  %v776_v34 = vsub.f32 2.0, %v768_v27  ;;  %v791_v20 = vmul.f32 %v783_v54, %v751_v26  ;;  %v1096_v61 = vld [vmem:[%s1707_s6] ss:$0 sm:$0xff] }
 0x12b   : > { %v1128_v35 = vpop.eup %1127  ;;  %v753_v37 = vadd.f32 %v737_v16, %v704_v13  ;;  %v754_v39 = vadd.f32 %v738_v19, %v710_v18  ;;  %v771_v42 = vmul.f32 %v1126_v24, %v670_v62  ;;  %v777_v6 = vsub.f32 2.0, %v769_v31 }
 0x12c   : > { %v1130_v45 = vpop.eup %1129  ;;  %v772_v50 = vmul.f32 %v1128_v35, %v671_v0  ;;  %v778_v46 = vsub.f32 2.0, %v770_v33  ;;  %v784_v53 = vmul.f32 %v1120_v17, %v776_v34  ;;  %v826_v5 = vrot.slane %v791_v20, 7 }
 0x12d   : > { %v773_v47 = vmul.f32 %v1130_v45, %v672_v7  ;;  %v779_v43 = vsub.f32 2.0, %v771_v42  ;;  %v785_v8 = vmul.f32 %v1122_v21, %v777_v6  ;;  %v790_v36 = vmul.f32 %v782_v1, %v750_v30 }
 0x12e   : > { %v755_v22 = vadd.f32 %v739_v49, %v716_v10  ;;  %v780_v51 = vsub.f32 2.0, %v772_v50  ;;  %v786_v25 = vmul.f32 %v1124_v28, %v778_v46  ;;  %v792_v58 = vmul.f32 %v784_v53, %v752_v32 }
 0x12f   : > { %v781_v59 = vsub.f32 2.0, %v773_v47  ;;  %v787_v52 = vmul.f32 %v1126_v24, %v779_v43  ;;  %v793_v56 = vmul.f32 %v785_v8, %v753_v37  ;;  %v827_v60 = vsel %vm577_vm0, %v826_v5, %v790_v36 }
 0x130   : > { %v756_v62 = vadd.f32 %v740_v23, %v722_v40  ;;  %v788_v57 = vmul.f32 %v1128_v35, %v780_v51  ;;  %v794_v38 = vmul.f32 %v786_v25, %v754_v39  ;;  %v828_v63 = vrot.slane %v792_v58, 6 }
 0x131   : > { %v757_v0 = vadd.f32 %v741_v29, %v728_v15  ;;  %v789_v2 = vmul.f32 %v1130_v45, %v781_v59  ;;  %v795_v41 = vmul.f32 %v787_v52, %v755_v22  ;;  %v830_v3 = vrot.slane %v793_v56, 5 }
 0x132   : > { %v796_v7 = vmul.f32 %v788_v57, %v756_v62  ;;  %v829_v55 = vsel %vm580_vm1, %v828_v63, %v827_v60  ;;  %v832_v9 = vrot.slane %v794_v38, 4 }
 0x133   : > { %v797_v10 = vmul.f32 %v789_v2, %v757_v0  ;;  %v831_v44 = vsel %vm583_vm2, %v830_v3, %v829_v55  ;;  %v834_v11 = vrot.slane %v795_v41, 3 }
 0x134   : > { %v833_v48 = vsel %vm586_vm3, %v832_v9, %v831_v44  ;;  %v836_v12 = vrot.slane %v796_v7, 2 }
 0x135   : > { %v835_v13 = vsel %vm589_vm4, %v834_v11, %v833_v48  ;;  %v838_v40 = vrot.slane %v797_v10, 1 }
 0x136   : > { %v837_v14 = vsel %vm592_vm5, %v836_v12, %v835_v13 }
 0x137   : > { %v839_v15 = vsel %vm595_vm6, %v838_v40, %v837_v14 }
 0x138   : > { %857 = vmatmul.f32.vlgmr.msra.gmra.mxu2 %v839_v15 }
 0x1bb   : > { %v858_v4 = vpop.f32.mrf.mxu2 }
 0x1bc   : > { %v859_v17 = vadd.f32 %v1096_v61, %v858_v4 }
 0x1be   : > { %861 = vst [vmem:[%s346_s14] sm:$0xff] %v859_v17 }
 0x1bf   : > { %1278 = shalt.err (!%p1275_p10)
}
 0x1c0   : > { %1027 = dma.vmem_to_hbm [thread:$0]  (%p1459_p3), %s876_s1, 128, %s878_s23, %s863_s30  }
 0x1c1 PF: > { %s889_s21 = sand.u32 1, %s1313_s24   ;;  %p1721_p12 = scmp.ge.s32.totalorder %s1325_s27, 2 }
 0x1c2   : > { %s890_s29 = scalar_lea.sflag [#allocation4], %s889_s21 }
 0x1c3   : > { %p1044_p13 = pnand %p1721_p12, %p1409_p6 }
 0x1c5   : > { %p1045_p0 = pneg %p1044_p13 }
 0x1c7   : > { %1308 = dma.done.wait (%p1045_p0), %s890_s29, 128  }
 0x1c8   : > { %1310 = vsyncadd (%p1045_p0), %s890_s29, 4294967168  ;;  %p22_p5 = scmp.ge.s32.totalorder %s1446_s16, 4   ;;  %s1722_s24 = smov %s1317_s25 }
 0x1c9   : > { %s1723_s25 = smov %s1321_s26  ;;  %s1724_s26 = smov %s1455_s18 }
 0x1ca   : > { %s1725_s27 = smov %s1446_s16  ;;  %24 = sbr.rel (!%p22_p5) target bundleno = 9 (0x9), region = 105 }
 0x1cf   :  { %896 = vsyncpa [#allocation3], 1 }
 0x1d0   :  { %898 = vsyncpa [#allocation3 + $0x1], 1 }
 0x1d1   :  { %899 = vsyncpa [#allocation6], 1 }
 0x1d2   :  { %900 = vsyncpa [#allocation9], 1 }
 0x1d3   :  { %901 = vsyncpa [#allocation4], 1 }
 0x1d4   :  { %903 = vsyncpa [#allocation4 + $0x1], 1 }

</bundles_post_ra>
